<compile_context>
chip_gen: v7x
topology: tpu7x:2x2x1
jax: 0.10.0
libtpu: 0.0.40
codegen_flags: <defaults>
</compile_context>

<pallas_src>
import math

import jax
import jax.numpy as jnp
from jax import lax
from jax.experimental import pallas as pl
from jax.experimental.pallas import tpu as pltpu

LANES = 128
SUBLANES = 8
MAX_TILE_ROWS = 4096        # (4096, 128) f32 tile = 2 MiB; 2 inputs x 2 bufs = 8 MiB VMEM
MAX_TILE_ROWS_V7 = 8192     # v7-class: HBM is fast enough that per-step overhead dominates
MAX_LAT_TILE_ROWS = 256     # tile cap for the fused small-term kernel
PALLAS_MIN_ELEMS = 128 * 1024   # below this a dedicated streaming call is not worth it


def _round_up(x, m):
    return ((x + m - 1) // m) * m


def _chip_traits():
    """Returns (has_two_tensorcores, is_v7_class) for the attached TPU generation."""
    try:
        kind = jax.devices()[0].device_kind.lower()
    except Exception:
        return False, False
    v7 = ("v7" in kind) or ("7x" in kind)
    two_tc = v7 or ("v4" in kind) or ("v5p" in kind)
    return two_tc, v7


def _vmem_capacity_bytes():
    try:
        return int(pltpu.get_tpu_info().vmem_capacity_bytes)
    except Exception:
        return 64 * 1024 * 1024   # conservative (v7x per-core VMEM)


# --------------------------------------------------------------------------------------
# Single-pair streaming SSE kernel (large tensors: reconstruction / big latent levels).
# --------------------------------------------------------------------------------------
def _make_pair_sse_kernel(rows, tile_rows, num_tiles, tiles_per_split, nsplit):
    ragged = (rows % tile_rows) != 0
    overflow = (nsplit * tiles_per_split) != num_tiles

    def accumulate(o_ref, a_ref, b_ref, t, mask_rows):
        d = a_ref[...].astype(jnp.float32) - b_ref[...].astype(jnp.float32)
        sq = d * d
        if mask_rows:
            # (tile_rows, 1) iota keeps the mask temporary tiny; broadcasts over lanes.
            row = t * tile_rows + lax.broadcasted_iota(jnp.int32, (tile_rows, 1), 0)
            sq = jnp.where(row < rows, sq, 0.0)
        # Pure-VPU fold of sublane groups onto the resident (8, 128) accumulator
        # (no per-step cross-lane XLU reduce).
        o_ref[...] += jnp.sum(
            sq.reshape(tile_rows // SUBLANES, SUBLANES, LANES), axis=0)

    def kernel(a_ref, b_ref, o_ref):
        if nsplit == 1:
            t = pl.program_id(0)
            first = t == 0
        else:
            s = pl.program_id(0)      # megacore split (parallel)
            j = pl.program_id(1)      # tile within split (reduction)
            t = s * tiles_per_split + j
            first = j == 0

        @pl.when(first)
        def _():
            o_ref[...] = jnp.zeros_like(o_ref)

        if not (ragged or overflow):
            accumulate(o_ref, a_ref, b_ref, t, False)
        else:
            @pl.when(t < num_tiles - 1)
            def _():
                accumulate(o_ref, a_ref, b_ref, t, False)

            @pl.when(t == num_tiles - 1)
            def _():
                accumulate(o_ref, a_ref, b_ref, t, ragged)
            # t > num_tiles - 1 (overflow tile of the last split): contributes nothing.

    return kernel


def _pair_sse_pallas(a, b):
    """sum((a - b)^2) over all elements, streamed through a Pallas reduction kernel."""
    assert a.shape == b.shape, (a.shape, b.shape)
    n = math.prod(a.shape)

    a_flat = a.reshape(-1)
    b_flat = b.reshape(-1)
    n_lane = _round_up(n, LANES)
    if n_lane != n:
        # TODO(synk): lane-ragged sizes still pay one padding copy; removing it needs a
        #             flat / manual-DMA path with element-level masking.
        a_flat = jnp.pad(a_flat, (0, n_lane - n))
        b_flat = jnp.pad(b_flat, (0, n_lane - n))
    rows = n_lane // LANES
    a2 = a_flat.reshape(rows, LANES)
    b2 = b_flat.reshape(rows, LANES)

    itemsize_a = jnp.dtype(a.dtype).itemsize
    itemsize_b = jnp.dtype(b.dtype).itemsize
    # Dtype-aware sublane multiple (f32 -> 8, bf16 -> 16, int8/fp8 -> 32).
    min_sub = max(SUBLANES, 32 // min(itemsize_a, itemsize_b))

    two_tc, v7_class = _chip_traits()
    tile_cap = MAX_TILE_ROWS_V7 if v7_class else MAX_TILE_ROWS
    if rows >= tile_cap:
        tile_rows = tile_cap
    else:
        # One (or two, if rows is not a sublane multiple) tile covering everything.
        tile_rows = max(min_sub, (rows // min_sub) * min_sub)

    num_tiles = -(-rows // tile_rows)
    nsplit = 2 if (two_tc and num_tiles >= 2) else 1   # split only on real 2-TC chips
    tps = -(-num_tiles // nsplit)

    kernel = _make_pair_sse_kernel(rows, tile_rows, num_tiles, tps, nsplit)

    if nsplit == 1:
        grid = (num_tiles,)
        in_idx = lambda t: (t, 0)
        out_idx = lambda t: (0, 0)
        semantics = ("arbitrary",)
        out_rows = SUBLANES
    else:
        grid = (nsplit, tps)
        # Clamp so the overflow tile of the last split never indexes past the array;
        # the kernel skips its contribution.
        in_idx = lambda s, j: (jnp.minimum(s * tps + j, num_tiles - 1), 0)
        out_idx = lambda s, j: (s, 0)
        semantics = ("parallel", "arbitrary")
        out_rows = nsplit * SUBLANES

    # Big tiles amortize the ~0.35 us per-grid-step overhead; leave explicit VMEM
    # headroom for the double-buffered input windows plus elementwise temporaries.
    need = 2 * tile_rows * LANES * (itemsize_a + itemsize_b)
    vmem_limit = int(min(max(need + 16 * 2**20, 24 * 2**20),
                         int(0.7 * _vmem_capacity_bytes())))

    out = pl.pallas_call(
        kernel,
        out_shape=jax.ShapeDtypeStruct((out_rows, LANES), jnp.float32),
        grid_spec=pltpu.PrefetchScalarGridSpec(
            num_scalar_prefetch=0,
            grid=grid,
            in_specs=[
                pl.BlockSpec((tile_rows, LANES), in_idx),
                pl.BlockSpec((tile_rows, LANES), in_idx),
            ],
            out_specs=pl.BlockSpec((SUBLANES, LANES), out_idx),
        ),
        compiler_params=pltpu.CompilerParams(
            dimension_semantics=semantics,
            vmem_limit_bytes=vmem_limit),
        cost_estimate=pl.CostEstimate(
            flops=3 * n_lane,
            transcendentals=0,
            bytes_accessed=n_lane * (itemsize_a + itemsize_b)
            + out_rows * LANES * 4),
    )(a2, b2)

    return jnp.sum(out)   # final (tiny) cross-lane reduce done by XLA


def mse_pallas(a, b):
    """mean((a - b)^2); very small inputs fall back to a plain fused XLA reduction."""
    n = math.prod(a.shape)
    if n < PALLAS_MIN_ELEMS:
        return jnp.mean((a.astype(jnp.float32) - b.astype(jnp.float32)) ** 2)
    return _pair_sse_pallas(a, b) / jnp.float32(n)


# --------------------------------------------------------------------------------------
# Fused multi-term SSE kernel (all SMALL terms of the loss in one pallas_call).
# --------------------------------------------------------------------------------------
def _fused_sse_kernel(tile_term_ref, a_ref, b_ref, o_ref):
    i = pl.program_id(0)

    @pl.when(i == 0)
    def _():
        o_ref[...] = jnp.zeros_like(o_ref)

    term = tile_term_ref[i]                              # SMEM scalar: which loss term
    d = a_ref[...].astype(jnp.float32) - b_ref[...].astype(jnp.float32)
    sq = d * d
    o_ref[term] += jnp.sum(
        sq.reshape(sq.shape[0] // SUBLANES, SUBLANES, LANES), axis=0)


def fused_mse_pallas(pairs):
    """Per-pair mean((a - b)^2) for a list of SMALL (a, b) pairs, in ONE pallas_call."""
    num_terms = len(pairs)
    assert num_terms > 0
    common = jnp.result_type(*[x.dtype for ab in pairs for x in ab])
    min_sub = max(SUBLANES, 32 // jnp.dtype(common).itemsize)

    counts, rows_per_term = [], []
    for a, b in pairs:
        assert a.shape == b.shape, (a.shape, b.shape)
        n = math.prod(a.shape)
        counts.append(n)
        rows_per_term.append(-(-n // LANES))

    # Tile large enough to keep the grid short, small enough that per-term padding
    # stays tiny (this path only ever sees tensors below PALLAS_MIN_ELEMS elements).
    tile_rows = min(MAX_LAT_TILE_ROWS, _round_up(max(rows_per_term), min_sub))
    chunk = tile_rows * LANES

    seg_a, seg_b, tile_term = [], [], []
    for t, (a, b) in enumerate(pairs):
        n = counts[t]
        n_pad = _round_up(n, chunk)
        af, bf = a.reshape(-1), b.reshape(-1)
        if af.dtype != common:
            af = af.astype(common)
        if bf.dtype != common:
            bf = bf.astype(common)
        if n_pad != n:
            af = jnp.pad(af, (0, n_pad - n))
            bf = jnp.pad(bf, (0, n_pad - n))
        seg_a.append(af.reshape(-1, LANES))
        seg_b.append(bf.reshape(-1, LANES))
        tile_term.extend([t] * (n_pad // chunk))

    a_cat = jnp.concatenate(seg_a, axis=0)
    b_cat = jnp.concatenate(seg_b, axis=0)
    tile_term_arr = jnp.asarray(tile_term, dtype=jnp.int32)
    total_tiles = len(tile_term)

    out = pl.pallas_call(
        _fused_sse_kernel,
        out_shape=jax.ShapeDtypeStruct((num_terms, SUBLANES, LANES), jnp.float32),
        grid_spec=pltpu.PrefetchScalarGridSpec(
            num_scalar_prefetch=1,
            grid=(total_tiles,),
            in_specs=[
                pl.BlockSpec((tile_rows, LANES), lambda i, tt: (i, 0)),
                pl.BlockSpec((tile_rows, LANES), lambda i, tt: (i, 0)),
            ],
            out_specs=pl.BlockSpec((num_terms, SUBLANES, LANES),
                                   lambda i, tt: (0, 0, 0)),
        ),
        compiler_params=pltpu.CompilerParams(
            dimension_semantics=("arbitrary",)),
    )(tile_term_arr, a_cat, b_cat)

    sse = jnp.sum(out, axis=(1, 2))
    return sse / jnp.asarray(counts, dtype=jnp.float32)


# --------------------------------------------------------------------------------------
# HierarchicalVqVaeLoss.forward equivalent (mse reconstruction loss).
# --------------------------------------------------------------------------------------
def hierarchical_vqvae_loss(original, reconstruction, encodings, embeddings,
                            beta=0.25, use_codebook_loss=False):
    # TODO(synk): the 'cross_entropy' reconstruction_loss_fn variant is not implemented.
    # TODO(synk): training (jax.grad) needs a custom_vjp to reproduce the distinct
    #             detach()/stop_gradient semantics of codebook vs commitment terms;
    #             the forward values computed here are identical.
    pairs = [(reconstruction, original)]
    pairs += [(enc, emb) for enc, emb in zip(encodings, embeddings)]
    sizes = [math.prod(a.shape) for a, _ in pairs]

    small = [i for i, n in enumerate(sizes) if n < PALLAS_MIN_ELEMS]
    large = [i for i, n in enumerate(sizes) if n >= PALLAS_MIN_ELEMS]

    mses = [None] * len(pairs)
    if small:
        # One fused pallas_call covers every small term (incl. the reconstruction pair).
        fused = fused_mse_pallas([pairs[i] for i in small])
        for pos, i in enumerate(small):
            mses[i] = fused[pos]
    for i in large:
        # Large terms stream through the dedicated big-tile pair kernel (no concat copy).
        a, b = pairs[i]
        mses[i] = _pair_sse_pallas(a, b) / jnp.float32(sizes[i])

    reconstruction_loss = mses[0]

    level_mses = mses[1:]
    if level_mses:
        commitment_loss = level_mses[0]
        for m in level_mses[1:]:
            commitment_loss = commitment_loss + m
    else:
        commitment_loss = jnp.float32(0.0)

    # detach() does not change the forward value, so the codebook loss equals the
    # commitment loss numerically.  Returned as f32(0.0) (not Python int 0) when
    # disabled so the output pytree leaf type stays stable.
    codebook_loss = commitment_loss if use_codebook_loss else jnp.float32(0.0)

    return reconstruction_loss, codebook_loss, beta * commitment_loss


def _ref_mse(a, b):
    return jnp.mean((a.astype(jnp.float32) - b.astype(jnp.float32)) ** 2)


if __name__ == "__main__":
    key = jax.random.PRNGKey(0)
    k = jax.random.split(key, 10)

    # Small shapes consistent with a hierarchical VQ-VAE for images (NCHW).
    original = jax.random.normal(k[0], (2, 4, 16, 16), dtype=jnp.float32)
    reconstruction = jax.random.normal(k[1], (2, 4, 16, 16), dtype=jnp.float32)

    # Two hierarchy levels of (encoding, embedding) latent feature maps.
    enc_top = jax.random.normal(k[2], (2, 32, 4, 4), dtype=jnp.float32)
    emb_top = jax.random.normal(k[3], (2, 32, 4, 4), dtype=jnp.float32)
    enc_bot = jax.random.normal(k[4], (2, 32, 8, 8), dtype=jnp.float32)
    emb_bot = jax.random.normal(k[5], (2, 32, 8, 8), dtype=jnp.float32)
    encodings, embeddings = [enc_top, enc_bot], [emb_top, emb_bot]
    beta = 0.25

    loss_fn = jax.jit(hierarchical_vqvae_loss,
                      static_argnames=("use_codebook_loss",))

    # With codebook loss enabled: one fused pallas_call covers all three small terms.
    rec, cb, comm = loss_fn(original, reconstruction, encodings, embeddings,
                            beta=beta, use_codebook_loss=True)
    jax.block_until_ready((rec, cb, comm))

    ref_rec = _ref_mse(reconstruction, original)
    ref_lvl = _ref_mse(enc_top, emb_top) + _ref_mse(enc_bot, emb_bot)
    assert jnp.allclose(rec, ref_rec, rtol=1e-5, atol=1e-6), (rec, ref_rec)
    assert jnp.allclose(cb, ref_lvl, rtol=1e-5, atol=1e-6), (cb, ref_lvl)
    assert jnp.allclose(comm, beta * ref_lvl, rtol=1e-5, atol=1e-6), (comm, beta * ref_lvl)

    # Default configuration (use_codebook_loss=False -> codebook term is zero).
    rec2, cb2, comm2 = loss_fn(original, reconstruction, encodings, embeddings,
                               beta=beta, use_codebook_loss=False)
    jax.block_until_ready((rec2, cb2, comm2))
    assert cb2 == 0
    assert jnp.allclose(comm2, beta * ref_lvl, rtol=1e-5, atol=1e-6)

    # ---- Exercise the large streaming pair-SSE kernel paths directly. ----
    # Multi-tile, lane-aligned, ragged last tile (+ megacore split on 2-TC chips).
    xa = jax.random.normal(k[6], (9192, 128), dtype=jnp.float32)
    xb = jax.random.normal(k[7], (9192, 128), dtype=jnp.float32)
    got = mse_pallas(xa, xb)
    jax.block_until_ready(got)
    assert jnp.allclose(got, _ref_mse(xa, xb), rtol=1e-4, atol=1e-6), (got, _ref_mse(xa, xb))

    # Lane-misaligned size (exercises the LANES-granularity pad + row masking).
    ya = jax.random.normal(k[8], (2600, 130), dtype=jnp.float32)
    yb = jax.random.normal(k[9], (2600, 130), dtype=jnp.float32)
    got2 = mse_pallas(ya, yb)
    jax.block_until_ready(got2)
    assert jnp.allclose(got2, _ref_mse(ya, yb), rtol=1e-4, atol=1e-6), (got2, _ref_mse(ya, yb))

    # Mixed native dtypes (bf16 vs f32) through the dtype-aware tiling path.
    za = jax.random.normal(k[6], (4, 8, 128, 65), dtype=jnp.float32).astype(jnp.bfloat16)
    zb = jax.random.normal(k[7], (4, 8, 128, 65), dtype=jnp.float32)
    got3 = mse_pallas(za, zb)
    jax.block_until_ready(got3)
    assert jnp.allclose(got3, _ref_mse(za, zb), rtol=1e-4, atol=1e-6), (got3, _ref_mse(za, zb))

    print("KERNEL_OK")
</pallas_src>

<mosaic_0001>
module attributes {stable_mosaic.version = 11 : i64} {
  func.func @_fused_sse_kernel(%arg0: i32, %arg1: memref<3xi32, #tpu.memory_space<smem>>, %arg2: memref<32x128xf32, #tpu.memory_space<vmem>>, %arg3: memref<32x128xf32, #tpu.memory_space<vmem>>, %arg4: memref<3x8x128xf32, #tpu.memory_space<vmem>>) attributes {dimension_semantics = [#tpu.dimension_semantics<arbitrary>], iteration_bounds = array<i64: 3>, scalar_prefetch = 1 : i64, scratch_operands = 0 : i64, tpu.core_type = #tpu.core_type<tc>, window_params = [{transform_indices = @transform_0, window_bounds = array<i64: 32, 128>}, {transform_indices = @transform_1, window_bounds = array<i64: 32, 128>}, {pipeline_mode = #tpu.pipeline_mode<synchronous>, transform_indices = @transform_2, window_bounds = array<i64: 3, 8, 128>}]} {
    %c0_i32 = arith.constant 0 : i32
    %0 = arith.cmpi eq, %arg0, %c0_i32 : i32
    %1 = arith.extui %0 : i1 to i32
    %c0_i32_0 = arith.constant 0 : i32
    %2 = arith.cmpi ne, %1, %c0_i32_0 : i32
    scf.if %2 {
      %cst_8 = arith.constant 0.000000e+00 : f32
      %19 = vector.broadcast %cst_8 : f32 to vector<3x8x128xf32>
      %c0_9 = arith.constant 0 : index
      %c0_10 = arith.constant 0 : index
      %c0_11 = arith.constant 0 : index
      %20 = vector.load %arg4[%c0_9, %c0_10, %c0_11] : memref<3x8x128xf32, #tpu.memory_space<vmem>>, vector<3x8x128xf32>
      tpu.vector_store %arg4[%c0_9, %c0_10, %c0_11], %19 {strides = array<i32>} : memref<3x8x128xf32, #tpu.memory_space<vmem>>, vector<3x8x128xf32>,
    } else {
    }
    %3 = arith.index_cast %arg0 : i32 to index
    %4 = memref.load %arg1[%3] : memref<3xi32, #tpu.memory_space<smem>>
    %c0 = arith.constant 0 : index
    %c0_1 = arith.constant 0 : index
    %5 = vector.load %arg2[%c0, %c0_1] : memref<32x128xf32, #tpu.memory_space<vmem>>, vector<32x128xf32>
    %c0_2 = arith.constant 0 : index
    %c0_3 = arith.constant 0 : index
    %6 = vector.load %arg3[%c0_2, %c0_3] : memref<32x128xf32, #tpu.memory_space<vmem>>, vector<32x128xf32>
    %7 = arith.subf %5, %6 : vector<32x128xf32>
    %8 = arith.mulf %7, %7 : vector<32x128xf32>
    %9 = arith.index_cast %4 : i32 to index
    %c0_4 = arith.constant 0 : index
    %c0_5 = arith.constant 0 : index
    %10 = vector.load %arg4[%9, %c0_4, %c0_5] : memref<3x8x128xf32, #tpu.memory_space<vmem>>, vector<1x8x128xf32>
    %11 = vector.shape_cast %10 : vector<1x8x128xf32> to vector<8x128xf32>
    %12 = vector.shape_cast %8 : vector<32x128xf32> to vector<4x8x128xf32>
    %cst = arith.constant dense<0.000000e+00> : vector<8x128xf32>
    %13 = vector.multi_reduction <add>, %12, %cst [0] : vector<4x8x128xf32> to vector<8x128xf32>
    %14 = arith.addf %11, %13 : vector<8x128xf32>
    %15 = arith.index_cast %4 : i32 to index
    %c0_6 = arith.constant 0 : index
    %c0_7 = arith.constant 0 : index
    %16 = vector.load %arg4[%15, %c0_6, %c0_7] : memref<3x8x128xf32, #tpu.memory_space<vmem>>, vector<1x8x128xf32>
    %17 = vector.shape_cast %16 : vector<1x8x128xf32> to vector<8x128xf32>
    %18 = vector.shape_cast %14 : vector<8x128xf32> to vector<1x8x128xf32>
    tpu.vector_store %arg4[%15, %c0_6, %c0_7], %18 {strides = array<i32>} : memref<3x8x128xf32, #tpu.memory_space<vmem>>, vector<1x8x128xf32>,
    return
  }
  func.func @transform_0(%arg0: i32, %arg1: memref<3xi32, #tpu.memory_space<smem>>) -> (i32, i32) {
    %c0_i32 = arith.constant 0 : i32
    %c0_i32_0 = arith.constant 0 : i32
    return %arg0, %c0_i32 : i32, i32
  }
  func.func @transform_1(%arg0: i32, %arg1: memref<3xi32, #tpu.memory_space<smem>>) -> (i32, i32) {
    %c0_i32 = arith.constant 0 : i32
    %c0_i32_0 = arith.constant 0 : i32
    return %arg0, %c0_i32 : i32, i32
  }
  func.func @transform_2(%arg0: i32, %arg1: memref<3xi32, #tpu.memory_space<smem>>) -> (i32, i32, i32) {
    %c0_i32 = arith.constant 0 : i32
    %c0_i32_0 = arith.constant 0 : i32
    %c0_i32_1 = arith.constant 0 : i32
    %c0_i32_2 = arith.constant 0 : i32
    return %c0_i32, %c0_i32_0, %c0_i32_1 : i32, i32, i32
  }
}

</mosaic_0001>

<bundles_post_ra>
// kernel: hierarchical_vqvae_loss.1
= control target key start
LH: loop header
LB: loop body
LE: loop exit
PB: predicated region body
PF: predicated region fallthrough
CT: control target
= control target key end

     0   :  { %s332_s0 = inlined_call_operand.vmem [shape: s32[3], index: 0, kind: input, shape index: {}]   ;;  %s333_s1 = inlined_call_operand.vmem [shape: f32[96,128], index: 1, kind: input, shape index: {}]   ;;  %s334_s2 = inlined_call_operand.vmem [shape: f32[96,128], index: 2, kind: input, shape index: {}]   ;;  %s335_s3 = inlined_call_operand.vmem [shape: f32[3,8,128], index: 3, kind: output, shape index: {}]  }
   0x1   :  { %s8_s14 = sshll.u32 %s332_s0, 4  ;;  %s9_s14 = int_to_ptr.vmem [resolvable:$true] %s8_s14 }
   0x2   :  { %s256_s15 = scalar_lea.vmem %s9_s14, 16  ;;  %p261_p1 = scmp.lt.s32.totalorder %s9_s14, %s9_s14 }
   0x3   :  { %p257_p0 = scmp.ne.s32.totalorder %s9_s14, %s256_s15  ;;  %p262_p2 = scmp.lt.s32.totalorder %s256_s15, %s256_s15 }
   0x5   :  { %p263_p3 = por %p262_p2, %p261_p1 }
   0x7   :  { %p264_p4 = pnand %p263_p3, %p257_p0 }
   0x9   :  { %267 = shalt.err (!%p264_p4)  }
   0xa   :  { %s278_s16 = smov [#allocation3]  }
   0xb   :  { %11 = dma.vmem_to_smem %s9_s14, 16, %s278_s16, [#allocation2] }
   0xc   :  { %272 = dma.done.wait [#allocation2], 16 }
   0xd   :  { %273 = vsyncadd [#allocation2], 4294967280 }
   0xe   :  { %13 = sfence }
   0xf   :  { %s303_s17 = smov 0  }
  0x10 LB: > { %s234_s0 = sadd.s32 4294967295, %s276_s17   ;;  %p237_p5 = scmp.ge.s32.totalorder %s276_s17, 1  ;;  %s276_s17 = sphi %s303_s17, %s19_s17  }
  0x11   : > { %p126_p6 = scmp.lt.s32.totalorder %s276_s17, 4 }
  0x13   : > { %p127_p7 = pnand %p237_p5, %p126_p6 }
  0x14   : > { %s238_s18 = sshll.u32 (!%p127_p7), %s234_s0, 2  ;;  %p242_p9 = scmp.ne.s32.totalorder (!%p127_p7), %s234_s0, 0 }
  0x15   : > { %130 = sbr.rel (%p127_p7) target bundleno = 50 (0x32), region = 28  ;;  %p149_p8 = scmp.lt.s32.totalorder (!%p127_p7), %s238_s18, 11 }
  0x1c   : > { %s337_s18 = smov (!%p149_p8, %s238_s18), 11  ;;  %163 = sbr.rel (%p242_p9) target bundleno = 35 (0x23), region = 32 }
  0x1d   : > { %s239_s19 = sshll.u32 %s337_s18, 3  ;;  %v279_v0 = vmov (!%p242_p9), 0.0  }
  0x1e   : > { %s152_s22 = scalar_lea.vmem %s333_s1, %s239_s19  ;;  %s158_s25 = scalar_lea.vmem %s334_s2, %s239_s19  ;;  %164 = vst [vmem:[%s335_s3] sm:$0xff] (!%p242_p9), %v279_v0  ;;  %165 = vst [vmem:[%s335_s3 + $0x8] sm:$0xff] (!%p242_p9), %v279_v0 }
  0x1f   : > { %166 = vst [vmem:[%s335_s3 + $0x10] sm:$0xff] (!%p242_p9), %v279_v0 }
  0x23 PF: > { %s167_s5 = sld [smem:[#allocation3 + %s234_s0]]  ;;  %v168_v1 = vld [vmem:[%s152_s22] sm:$0xff]  ;;  %v169_v2 = vld [vmem:[%s152_s22 + $0x8] sm:$0xff]  ;;  %v170_v3 = vld [vmem:[%s152_s22 + $0x10] sm:$0xff] }
  0x24   : > { %v171_v4 = vld [vmem:[%s152_s22 + $0x18] sm:$0xff]  ;;  %v172_v5 = vld [vmem:[%s158_s25] sm:$0xff]  ;;  %v173_v6 = vld [vmem:[%s158_s25 + $0x8] sm:$0xff] }
  0x25   : > { %v174_v7 = vld [vmem:[%s158_s25 + $0x10] sm:$0xff]  ;;  %v175_v8 = vld [vmem:[%s158_s25 + $0x18] sm:$0xff]  ;;  %v176_v9 = vsub.f32 %v168_v1, %v172_v5  ;;  %v177_v10 = vsub.f32 %v169_v2, %v173_v6 }
  0x26   : > { %v178_v11 = vsub.f32 %v170_v3, %v174_v7  ;;  %v179_v12 = vsub.f32 %v171_v4, %v175_v8 }
  0x27   : > { %v180_v13 = vmul.f32 %v176_v9, %v176_v9  ;;  %v181_v14 = vmul.f32 %v177_v10, %v177_v10 }
  0x28   : > { %v182_v15 = vmul.f32 %v178_v11, %v178_v11  ;;  %v183_v16 = vmul.f32 %v179_v12, %v179_v12 }
  0x29   : > { %s243_s6 = sshll.u32 %s167_s5, 3  ;;  %v187_v17 = vadd.f32 %v181_v14, %v180_v13 }
  0x2a   : > { %s185_s9 = scalar_lea.vmem %s335_s3, %s243_s6 }
  0x2b   : > { %v188_v18 = vadd.f32 %v187_v17, %v182_v15  ;;  %v186_v19 = vld [vmem:[%s185_s9] sm:$0xff] }
  0x2d   : > { %v189_v20 = vadd.f32 %v188_v18, %v183_v16 }
  0x2f   : > { %v190_v21 = vadd.f32 %v189_v20, %v186_v19 }
  0x31   : > { %191 = vst [vmem:[%s185_s9] sm:$0xff] %v190_v21 }
  0x32 PF: > { %s19_s17 = sadd.s32 1, %s276_s17  }
  0x33   : > { %p16_p10 = scmp.ge.s32.totalorder %s19_s17, 5  }
  0x35   :  { %18 = sbr.rel (!%p16_p10) target bundleno = 16 (0x10), region = 62 }

</bundles_post_ra>
